<compile_context>
chip_gen: v7x
topology: tpu7x:2x2x1
jax: 0.10.0
libtpu: 0.0.40
codegen_flags: <defaults>
</compile_context>

<pallas_src>
import jax
import jax.numpy as jnp
import numpy as np
from jax import lax
from jax.experimental import pallas as pl
from jax.experimental.pallas import tpu as pltpu

KSIZE = 3          # kernel_size=3, pad=1, padding_mode='reflect'
EPS = 1e-5         # BatchNorm1d default eps
NEG_SLOPE = 0.01   # LeakyReLU default negative_slope


def _reflect_taps(a, first, last):
    """a: (C, L). Returns (a[l-1], a[l], a[l+1]) with torch 'reflect' padding at
    the two boundary columns, built from lane rolls. `first`/`last` are hoisted
    (1, L) boolean masks (lane==0 / lane==L-1)."""
    l = a.shape[-1]
    prev = pltpu.roll(a, shift=1, axis=1)        # prev[:, l] = a[:, l-1] (wraps at l=0)
    nxt = pltpu.roll(a, shift=l - 1, axis=1)     # nxt[:, l]  = a[:, l+1] (wraps at l=L-1)
    prev_r = jnp.where(first, nxt, prev)         # at l=0   need a[:, 1]   == nxt[:, 0]
    nxt_r = jnp.where(last, prev, nxt)           # at l=L-1 need a[:, L-2] == prev[:, L-1]
    return prev_r, a, nxt_r


def _conv3(w_ref, taps):
    """w_ref: (3, Cout, C); taps: 3 x (C, L). Per-tap MXU dots, f32 accumulation."""
    acc = jnp.dot(w_ref[0], taps[0], preferred_element_type=jnp.float32)
    acc = acc + jnp.dot(w_ref[1], taps[1], preferred_element_type=jnp.float32)
    acc = acc + jnp.dot(w_ref[2], taps[2], preferred_element_type=jnp.float32)
    return acc


def _stats_kernel(x_ref, w1_ref, sum_ref, sq_ref):
    # x_ref: (NB, Cin, L); w1_ref: (3, Cout, Cin); outputs: (1, Cout, 1) f32,
    # accumulated over the NB batch elements of this grid step.
    nb, _, l = x_ref.shape
    cout = w1_ref.shape[1]
    first = lax.broadcasted_iota(jnp.int32, (1, l), 1) == 0
    last = lax.broadcasted_iota(jnp.int32, (1, l), 1) == l - 1

    def body(i, carry):
        s_acc, q_acc = carry
        x = x_ref[i]
        h = _conv3(w1_ref, _reflect_taps(x, first, last))        # conv1, f32
        s_acc = s_acc + jnp.sum(h, axis=-1, keepdims=True)
        q_acc = q_acc + jnp.sum(h * h, axis=-1, keepdims=True)
        return s_acc, q_acc

    zeros = jnp.zeros((cout, 1), jnp.float32)
    s_acc, q_acc = lax.fori_loop(0, nb, body, (zeros, zeros), unroll=True)
    sum_ref[0] = s_acc
    sq_ref[0] = q_acc


def _fused_kernel(x_ref, w1s_ref, b1_ref, w2_ref, wskip_ref, o_ref):
    # x_ref: (NB, Cin, L); w1s_ref: (3, Cout, Cin) BN-folded; b1_ref: (Cout, 1);
    # w2_ref: (3, Cout, Cout); wskip_ref: (Cout, Cin); o_ref: (NB, Cout, L).
    nb, _, l = x_ref.shape
    first = lax.broadcasted_iota(jnp.int32, (1, l), 1) == 0
    last = lax.broadcasted_iota(jnp.int32, (1, l), 1) == l - 1

    def body(i, carry):
        x = x_ref[i]
        # conv1 with BN folded into weights + per-channel bias, then LeakyReLU.
        h = _conv3(w1s_ref, _reflect_taps(x, first, last)) + b1_ref[...]
        h = jnp.where(h > 0, h, NEG_SLOPE * h)
        # conv2: three per-tap dots (no concat); skip: separate tiny 1x1 dot.
        y = _conv3(w2_ref, _reflect_taps(h, first, last))
        y = y + jnp.dot(wskip_ref[...], x, preferred_element_type=jnp.float32)
        o_ref[i] = y.astype(o_ref.dtype)
        return carry

    lax.fori_loop(0, nb, body, 0, unroll=True)


def _pick_block_batch(n, cin, cout, l, itemsize):
    """How many batch elements per grid step."""
    io_per_batch = (cin + cout) * l * itemsize             # HBM bytes per batch element
    work_per_batch = (3 * cin + 7 * cout) * l * 4          # in-kernel f32 working set
    nb = max(1, min(n,
                    (1 << 20) // max(io_per_batch, 1),     # ~1 MiB of I/O per step
                    (12 << 20) // max(work_per_batch, 1)))  # stay well inside VMEM budget
    # Keep enough grid steps for DMA overlap / v7x megacore (>= min(N, 8) steps).
    nb = min(nb, max(1, n // min(n, 8)))
    while n % nb != 0:                                      # exact blocking
        nb -= 1
    return nb


@jax.jit
def input_residual_conv(x_ncw, w1_oik, w2_oik, wskip_oik):
    """x_ncw: (N, Cin, L); weights in torch Conv1d layout (Cout, Cin, K).
    Returns (N, Cout, L). BatchNorm uses train-mode (batch) statistics."""
    n, cin, l = x_ncw.shape
    cout = w1_oik.shape[0]
    assert l % 128 == 0 and l >= 2, "L must be a multiple of 128 (pad if needed)"
    dt = x_ncw.dtype

    nb = _pick_block_batch(n, cin, cout, l, jnp.dtype(dt).itemsize)
    nblk = n // nb

    # Tiny weight re-layouts (negligible vs. activation traffic).
    w1_taps = jnp.transpose(w1_oik, (2, 0, 1)).astype(dt)       # (3, Cout, Cin)
    w2_taps = jnp.transpose(w2_oik, (2, 0, 1)).astype(dt)       # (3, Cout, Cout)
    wskip = wskip_oik[:, :, 0].astype(dt)                       # (Cout, Cin)
    # (use_skip=False would simply pass zeros for wskip)

    cparams = pltpu.CompilerParams(
        dimension_semantics=("parallel",),        # megacore sharding on v7x, free elsewhere
        vmem_limit_bytes=32 * 1024 * 1024,        # explicit budget: fits v5e/v6e/v7x
    )

    # ---- Pass 1: conv1 + per-step per-channel sum / sum-of-squares (f32). ----
    sums, sqs = pl.pallas_call(
        _stats_kernel,
        grid=(nblk,),
        in_specs=[
            pl.BlockSpec((nb, cin, l), lambda b: (b, 0, 0)),
            pl.BlockSpec((KSIZE, cout, cin), lambda b: (0, 0, 0)),
        ],
        out_specs=[
            pl.BlockSpec((1, cout, 1), lambda b: (b, 0, 0)),
            pl.BlockSpec((1, cout, 1), lambda b: (b, 0, 0)),
        ],
        out_shape=[
            jax.ShapeDtypeStruct((nblk, cout, 1), jnp.float32),
            jax.ShapeDtypeStruct((nblk, cout, 1), jnp.float32),
        ],
        compiler_params=cparams,
    )(x_ncw, w1_taps)

    # Tiny O(Cout) cross-step reduction in XLA (keeps BN stats global over (N, L)).
    cnt = float(n * l)
    mean = jnp.sum(sums, axis=0) / cnt                                   # (Cout, 1)
    var = jnp.maximum(jnp.sum(sqs, axis=0) / cnt - mean * mean, 0.0)     # biased variance
    inv_std = lax.rsqrt(var + EPS)                                       # (Cout, 1)

    # Fold BatchNorm into the pass-2 conv1 weights (weight-side, cheap in XLA).
    w1_scaled = (w1_taps.astype(jnp.float32) * inv_std[None, :, :]).astype(dt)
    bias1 = (-mean * inv_std).astype(jnp.float32)                        # (Cout, 1)

    # ---- Pass 2: conv1 (BN-folded) -> LeakyReLU -> conv2 + 1x1 skip. ----
    out = pl.pallas_call(
        _fused_kernel,
        grid=(nblk,),
        in_specs=[
            pl.BlockSpec((nb, cin, l), lambda b: (b, 0, 0)),
            pl.BlockSpec((KSIZE, cout, cin), lambda b: (0, 0, 0)),
            pl.BlockSpec((cout, 1), lambda b: (0, 0)),
            pl.BlockSpec((KSIZE, cout, cout), lambda b: (0, 0, 0)),
            pl.BlockSpec((cout, cin), lambda b: (0, 0)),
        ],
        out_specs=pl.BlockSpec((nb, cout, l), lambda b: (b, 0, 0)),
        out_shape=jax.ShapeDtypeStruct((n, cout, l), dt),
        compiler_params=cparams,
    )(x_ncw, w1_scaled, bias1, w2_taps, wskip)
    return out


def reference_ncw(x, w1, w2, wskip):
    # Pure-JAX reference in torch NCW / OIK conventions.
    dn = ('NCH', 'OIH', 'NCH')

    def conv_reflect(inp, w):
        ip = jnp.pad(inp, ((0, 0), (0, 0), (1, 1)), mode='reflect')
        return lax.conv_general_dilated(ip, w, (1,), 'VALID', dimension_numbers=dn)

    h = conv_reflect(x, w1)
    mean = jnp.mean(h, axis=(0, 2), keepdims=True)
    var = jnp.mean((h - mean) ** 2, axis=(0, 2), keepdims=True)
    h = (h - mean) / jnp.sqrt(var + EPS)
    h = jnp.where(h > 0, h, NEG_SLOPE * h)
    h = conv_reflect(h, w2)
    skip = lax.conv_general_dilated(x, wskip, (1,), 'VALID', dimension_numbers=dn)
    return h + skip


if __name__ == "__main__":
    N, C_IN, C_OUT, L = 2, 4, 8, 256

    key = jax.random.PRNGKey(0)
    kx, k1, k2, k3 = jax.random.split(key, 4)
    x = jax.random.normal(kx, (N, C_IN, L), jnp.float32)
    # Deterministic synthetic parameters (torch Conv1d weight layout: (Cout, Cin, K)).
    w1 = 0.2 * jax.random.normal(k1, (C_OUT, C_IN, KSIZE), jnp.float32)
    w2 = 0.2 * jax.random.normal(k2, (C_OUT, C_OUT, KSIZE), jnp.float32)
    wskip = 0.2 * jax.random.normal(k3, (C_OUT, C_IN, 1), jnp.float32)

    out = jax.block_until_ready(input_residual_conv(x, w1, w2, wskip))
    ref = jax.block_until_ready(reference_ncw(x, w1, w2, wskip))

    assert out.shape == (N, C_OUT, L), out.shape
    err = float(np.max(np.abs(np.asarray(out) - np.asarray(ref))))
    assert np.allclose(np.asarray(out), np.asarray(ref), rtol=2e-4, atol=2e-4), err
    print("KERNEL_OK")
</pallas_src>

<mosaic_0001>
module attributes {stable_mosaic.version = 11 : i64} {
  func.func @_stats_kernel(%arg0: i32, %arg1: memref<1x4x256xf32, #tpu.memory_space<vmem>>, %arg2: memref<3x8x4xf32, #tpu.memory_space<vmem>>, %arg3: memref<1x8x1xf32, #tpu.memory_space<vmem>>, %arg4: memref<1x8x1xf32, #tpu.memory_space<vmem>>) attributes {dimension_semantics = [#tpu.dimension_semantics<parallel>], iteration_bounds = array<i64: 2>, scalar_prefetch = 0 : i64, scratch_operands = 0 : i64, tpu.core_type = #tpu.core_type<tc>, window_params = [{transform_indices = @transform_0, window_bounds = array<i64: 1, 4, 256>}, {pipeline_mode = #tpu.pipeline_mode<synchronous>, transform_indices = @transform_1, window_bounds = array<i64: 3, 8, 4>}, {transform_indices = @transform_2, window_bounds = array<i64: 1, 8, 1>}, {transform_indices = @transform_3, window_bounds = array<i64: 1, 8, 1>}]} {
    %0 = tpu.iota {dimensions = array<i32: 1>} : vector<1x256xi32>
    %c0_i32 = arith.constant 0 : i32
    %1 = vector.broadcast %c0_i32 : i32 to vector<1x256xi32>
    %2 = arith.cmpi eq, %0, %1 : vector<1x256xi32>
    %3 = tpu.iota {dimensions = array<i32: 1>} : vector<1x256xi32>
    %c255_i32 = arith.constant 255 : i32
    %4 = vector.broadcast %c255_i32 : i32 to vector<1x256xi32>
    %5 = arith.cmpi eq, %3, %4 : vector<1x256xi32>
    %cst = arith.constant 0.000000e+00 : f32
    %6 = vector.broadcast %cst : f32 to vector<8x1xf32>
    %c0_i32_0 = arith.constant 0 : i32
    %7 = arith.index_cast %c0_i32_0 : i32 to index
    %c0 = arith.constant 0 : index
    %c0_1 = arith.constant 0 : index
    %8 = vector.load %arg1[%7, %c0, %c0_1] : memref<1x4x256xf32, #tpu.memory_space<vmem>>, vector<1x4x256xf32>
    %9 = vector.shape_cast %8 : vector<1x4x256xf32> to vector<4x256xf32>
    %c1_i32 = arith.constant 1 : i32
    %10 = tpu.dynamic_rotate %9 by %c1_i32 dim 1 : vector<4x256xf32>, i32 -> vector<4x256xf32>
    %c255_i32_2 = arith.constant 255 : i32
    %11 = tpu.dynamic_rotate %9 by %c255_i32_2 dim 1 : vector<4x256xf32>, i32 -> vector<4x256xf32>
    %12 = vector.shape_cast %2 : vector<1x256xi1> to vector<1x256xi1>
    %13 = vector.broadcast %12 : vector<1x256xi1> to vector<4x256xi1>
    %14 = arith.select %13, %11, %10 : vector<4x256xi1>, vector<4x256xf32>
    %15 = vector.shape_cast %5 : vector<1x256xi1> to vector<1x256xi1>
    %16 = vector.broadcast %15 : vector<1x256xi1> to vector<4x256xi1>
    %17 = arith.select %16, %10, %11 : vector<4x256xi1>, vector<4x256xf32>
    %c0_3 = arith.constant 0 : index
    %c0_4 = arith.constant 0 : index
    %c0_5 = arith.constant 0 : index
    %18 = vector.load %arg2[%c0_3, %c0_4, %c0_5] : memref<3x8x4xf32, #tpu.memory_space<vmem>>, vector<1x8x4xf32>
    %19 = vector.shape_cast %18 : vector<1x8x4xf32> to vector<8x4xf32>
    %cst_6 = arith.constant dense<0.000000e+00> : vector<8x256xf32>
    %20 = tpu.matmul %19, %14, %cst_6 {dimension_numbers = #tpu.dot_dimension_numbers<[1], [0], [0], [1], [0, 0, 1, 1], [], []>} : vector<8x4xf32>, vector<4x256xf32>, vector<8x256xf32> -> vector<8x256xf32>
    %c1 = arith.constant 1 : index
    %c0_7 = arith.constant 0 : index
    %c0_8 = arith.constant 0 : index
    %21 = vector.load %arg2[%c1, %c0_7, %c0_8] : memref<3x8x4xf32, #tpu.memory_space<vmem>>, vector<1x8x4xf32>
    %22 = vector.shape_cast %21 : vector<1x8x4xf32> to vector<8x4xf32>
    %cst_9 = arith.constant dense<0.000000e+00> : vector<8x256xf32>
    %23 = tpu.matmul %22, %9, %cst_9 {dimension_numbers = #tpu.dot_dimension_numbers<[1], [0], [0], [1], [0, 0, 1, 1], [], []>} : vector<8x4xf32>, vector<4x256xf32>, vector<8x256xf32> -> vector<8x256xf32>
    %24 = arith.addf %20, %23 : vector<8x256xf32>
    %c2 = arith.constant 2 : index
    %c0_10 = arith.constant 0 : index
    %c0_11 = arith.constant 0 : index
    %25 = vector.load %arg2[%c2, %c0_10, %c0_11] : memref<3x8x4xf32, #tpu.memory_space<vmem>>, vector<1x8x4xf32>
    %26 = vector.shape_cast %25 : vector<1x8x4xf32> to vector<8x4xf32>
    %cst_12 = arith.constant dense<0.000000e+00> : vector<8x256xf32>
    %27 = tpu.matmul %26, %17, %cst_12 {dimension_numbers = #tpu.dot_dimension_numbers<[1], [0], [0], [1], [0, 0, 1, 1], [], []>} : vector<8x4xf32>, vector<4x256xf32>, vector<8x256xf32> -> vector<8x256xf32>
    %28 = arith.addf %24, %27 : vector<8x256xf32>
    %cst_13 = arith.constant dense<0.000000e+00> : vector<8xf32>
    %29 = vector.multi_reduction <add>, %28, %cst_13 [1] : vector<8x256xf32> to vector<8xf32>
    %30 = vector.shape_cast %29 : vector<8xf32> to vector<8x1xf32>
    %31 = arith.addf %6, %30 : vector<8x1xf32>
    %32 = arith.mulf %28, %28 : vector<8x256xf32>
    %cst_14 = arith.constant dense<0.000000e+00> : vector<8xf32>
    %33 = vector.multi_reduction <add>, %32, %cst_14 [1] : vector<8x256xf32> to vector<8xf32>
    %34 = vector.shape_cast %33 : vector<8xf32> to vector<8x1xf32>
    %35 = arith.addf %6, %34 : vector<8x1xf32>
    %c1_i32_15 = arith.constant 1 : i32
    %c0_16 = arith.constant 0 : index
    %c0_17 = arith.constant 0 : index
    %c0_18 = arith.constant 0 : index
    %36 = vector.load %arg3[%c0_16, %c0_17, %c0_18] : memref<1x8x1xf32, #tpu.memory_space<vmem>>, vector<1x8x1xf32>
    %37 = vector.shape_cast %36 : vector<1x8x1xf32> to vector<8x1xf32>
    %38 = vector.shape_cast %31 : vector<8x1xf32> to vector<1x8x1xf32>
    tpu.vector_store %arg3[%c0_16, %c0_17, %c0_18], %38 {strides = array<i32>} : memref<1x8x1xf32, #tpu.memory_space<vmem>>, vector<1x8x1xf32>,
    %c0_19 = arith.constant 0 : index
    %c0_20 = arith.constant 0 : index
    %c0_21 = arith.constant 0 : index
    %39 = vector.load %arg4[%c0_19, %c0_20, %c0_21] : memref<1x8x1xf32, #tpu.memory_space<vmem>>, vector<1x8x1xf32>
    %40 = vector.shape_cast %39 : vector<1x8x1xf32> to vector<8x1xf32>
    %41 = vector.shape_cast %35 : vector<8x1xf32> to vector<1x8x1xf32>
    tpu.vector_store %arg4[%c0_19, %c0_20, %c0_21], %41 {strides = array<i32>} : memref<1x8x1xf32, #tpu.memory_space<vmem>>, vector<1x8x1xf32>,
    return
  }
  func.func @transform_0(%arg0: i32) -> (i32, i32, i32) {
    %c0_i32 = arith.constant 0 : i32
    %c0_i32_0 = arith.constant 0 : i32
    %c0_i32_1 = arith.constant 0 : i32
    return %arg0, %c0_i32, %c0_i32_0 : i32, i32, i32
  }
  func.func @transform_1(%arg0: i32) -> (i32, i32, i32) {
    %c0_i32 = arith.constant 0 : i32
    %c0_i32_0 = arith.constant 0 : i32
    %c0_i32_1 = arith.constant 0 : i32
    %c0_i32_2 = arith.constant 0 : i32
    return %c0_i32, %c0_i32_0, %c0_i32_1 : i32, i32, i32
  }
  func.func @transform_2(%arg0: i32) -> (i32, i32, i32) {
    %c0_i32 = arith.constant 0 : i32
    %c0_i32_0 = arith.constant 0 : i32
    %c0_i32_1 = arith.constant 0 : i32
    return %arg0, %c0_i32, %c0_i32_0 : i32, i32, i32
  }
  func.func @transform_3(%arg0: i32) -> (i32, i32, i32) {
    %c0_i32 = arith.constant 0 : i32
    %c0_i32_0 = arith.constant 0 : i32
    %c0_i32_1 = arith.constant 0 : i32
    return %arg0, %c0_i32, %c0_i32_0 : i32, i32, i32
  }
}

module attributes {stable_mosaic.version = 11 : i64} {
  func.func @_fused_kernel(%arg0: i32, %arg1: memref<1x4x256xf32, #tpu.memory_space<vmem>>, %arg2: memref<3x8x4xf32, #tpu.memory_space<vmem>>, %arg3: memref<8x1xf32, #tpu.memory_space<vmem>>, %arg4: memref<3x8x8xf32, #tpu.memory_space<vmem>>, %arg5: memref<8x4xf32, #tpu.memory_space<vmem>>, %arg6: memref<1x8x256xf32, #tpu.memory_space<vmem>>) attributes {dimension_semantics = [#tpu.dimension_semantics<parallel>], iteration_bounds = array<i64: 2>, scalar_prefetch = 0 : i64, scratch_operands = 0 : i64, tpu.core_type = #tpu.core_type<tc>, window_params = [{transform_indices = @transform_0, window_bounds = array<i64: 1, 4, 256>}, {pipeline_mode = #tpu.pipeline_mode<synchronous>, transform_indices = @transform_1, window_bounds = array<i64: 3, 8, 4>}, {pipeline_mode = #tpu.pipeline_mode<synchronous>, transform_indices = @transform_2, window_bounds = array<i64: 8, 1>}, {pipeline_mode = #tpu.pipeline_mode<synchronous>, transform_indices = @transform_3, window_bounds = array<i64: 3, 8, 8>}, {pipeline_mode = #tpu.pipeline_mode<synchronous>, transform_indices = @transform_4, window_bounds = array<i64: 8, 4>}, {transform_indices = @transform_5, window_bounds = array<i64: 1, 8, 256>}]} {
    %0 = tpu.iota {dimensions = array<i32: 1>} : vector<1x256xi32>
    %c0_i32 = arith.constant 0 : i32
    %1 = vector.broadcast %c0_i32 : i32 to vector<1x256xi32>
    %2 = arith.cmpi eq, %0, %1 : vector<1x256xi32>
    %3 = tpu.iota {dimensions = array<i32: 1>} : vector<1x256xi32>
    %c255_i32 = arith.constant 255 : i32
    %4 = vector.broadcast %c255_i32 : i32 to vector<1x256xi32>
    %5 = arith.cmpi eq, %3, %4 : vector<1x256xi32>
    %c0_i32_0 = arith.constant 0 : i32
    %6 = arith.index_cast %c0_i32_0 : i32 to index
    %c0 = arith.constant 0 : index
    %c0_1 = arith.constant 0 : index
    %7 = vector.load %arg1[%6, %c0, %c0_1] : memref<1x4x256xf32, #tpu.memory_space<vmem>>, vector<1x4x256xf32>
    %8 = vector.shape_cast %7 : vector<1x4x256xf32> to vector<4x256xf32>
    %c1_i32 = arith.constant 1 : i32
    %9 = tpu.dynamic_rotate %8 by %c1_i32 dim 1 : vector<4x256xf32>, i32 -> vector<4x256xf32>
    %c255_i32_2 = arith.constant 255 : i32
    %10 = tpu.dynamic_rotate %8 by %c255_i32_2 dim 1 : vector<4x256xf32>, i32 -> vector<4x256xf32>
    %11 = vector.shape_cast %2 : vector<1x256xi1> to vector<1x256xi1>
    %12 = vector.broadcast %11 : vector<1x256xi1> to vector<4x256xi1>
    %13 = arith.select %12, %10, %9 : vector<4x256xi1>, vector<4x256xf32>
    %14 = vector.shape_cast %5 : vector<1x256xi1> to vector<1x256xi1>
    %15 = vector.broadcast %14 : vector<1x256xi1> to vector<4x256xi1>
    %16 = arith.select %15, %9, %10 : vector<4x256xi1>, vector<4x256xf32>
    %c0_3 = arith.constant 0 : index
    %c0_4 = arith.constant 0 : index
    %c0_5 = arith.constant 0 : index
    %17 = vector.load %arg2[%c0_3, %c0_4, %c0_5] : memref<3x8x4xf32, #tpu.memory_space<vmem>>, vector<1x8x4xf32>
    %18 = vector.shape_cast %17 : vector<1x8x4xf32> to vector<8x4xf32>
    %cst = arith.constant dense<0.000000e+00> : vector<8x256xf32>
    %19 = tpu.matmul %18, %13, %cst {dimension_numbers = #tpu.dot_dimension_numbers<[1], [0], [0], [1], [0, 0, 1, 1], [], []>} : vector<8x4xf32>, vector<4x256xf32>, vector<8x256xf32> -> vector<8x256xf32>
    %c1 = arith.constant 1 : index
    %c0_6 = arith.constant 0 : index
    %c0_7 = arith.constant 0 : index
    %20 = vector.load %arg2[%c1, %c0_6, %c0_7] : memref<3x8x4xf32, #tpu.memory_space<vmem>>, vector<1x8x4xf32>
    %21 = vector.shape_cast %20 : vector<1x8x4xf32> to vector<8x4xf32>
    %cst_8 = arith.constant dense<0.000000e+00> : vector<8x256xf32>
    %22 = tpu.matmul %21, %8, %cst_8 {dimension_numbers = #tpu.dot_dimension_numbers<[1], [0], [0], [1], [0, 0, 1, 1], [], []>} : vector<8x4xf32>, vector<4x256xf32>, vector<8x256xf32> -> vector<8x256xf32>
    %23 = arith.addf %19, %22 : vector<8x256xf32>
    %c2 = arith.constant 2 : index
    %c0_9 = arith.constant 0 : index
    %c0_10 = arith.constant 0 : index
    %24 = vector.load %arg2[%c2, %c0_9, %c0_10] : memref<3x8x4xf32, #tpu.memory_space<vmem>>, vector<1x8x4xf32>
    %25 = vector.shape_cast %24 : vector<1x8x4xf32> to vector<8x4xf32>
    %cst_11 = arith.constant dense<0.000000e+00> : vector<8x256xf32>
    %26 = tpu.matmul %25, %16, %cst_11 {dimension_numbers = #tpu.dot_dimension_numbers<[1], [0], [0], [1], [0, 0, 1, 1], [], []>} : vector<8x4xf32>, vector<4x256xf32>, vector<8x256xf32> -> vector<8x256xf32>
    %27 = arith.addf %23, %26 : vector<8x256xf32>
    %c0_12 = arith.constant 0 : index
    %c0_13 = arith.constant 0 : index
    %28 = vector.load %arg3[%c0_12, %c0_13] : memref<8x1xf32, #tpu.memory_space<vmem>>, vector<8x1xf32>
    %29 = vector.broadcast %28 : vector<8x1xf32> to vector<8x256xf32>
    %30 = arith.addf %27, %29 : vector<8x256xf32>
    %cst_14 = arith.constant 0.000000e+00 : f32
    %31 = vector.broadcast %cst_14 : f32 to vector<8x256xf32>
    %32 = arith.cmpf ogt, %30, %31 : vector<8x256xf32>
    %cst_15 = arith.constant 0.00999999977 : f32
    %33 = vector.broadcast %cst_15 : f32 to vector<8x256xf32>
    %34 = arith.mulf %33, %30 : vector<8x256xf32>
    %35 = arith.select %32, %30, %34 : vector<8x256xi1>, vector<8x256xf32>
    %c1_i32_16 = arith.constant 1 : i32
    %36 = tpu.dynamic_rotate %35 by %c1_i32_16 dim 1 : vector<8x256xf32>, i32 -> vector<8x256xf32>
    %c255_i32_17 = arith.constant 255 : i32
    %37 = tpu.dynamic_rotate %35 by %c255_i32_17 dim 1 : vector<8x256xf32>, i32 -> vector<8x256xf32>
    %38 = vector.shape_cast %2 : vector<1x256xi1> to vector<1x256xi1>
    %39 = vector.broadcast %38 : vector<1x256xi1> to vector<8x256xi1>
    %40 = arith.select %39, %37, %36 : vector<8x256xi1>, vector<8x256xf32>
    %41 = vector.shape_cast %5 : vector<1x256xi1> to vector<1x256xi1>
    %42 = vector.broadcast %41 : vector<1x256xi1> to vector<8x256xi1>
    %43 = arith.select %42, %36, %37 : vector<8x256xi1>, vector<8x256xf32>
    %c0_18 = arith.constant 0 : index
    %c0_19 = arith.constant 0 : index
    %c0_20 = arith.constant 0 : index
    %44 = vector.load %arg4[%c0_18, %c0_19, %c0_20] : memref<3x8x8xf32, #tpu.memory_space<vmem>>, vector<1x8x8xf32>
    %45 = vector.shape_cast %44 : vector<1x8x8xf32> to vector<8x8xf32>
    %cst_21 = arith.constant dense<0.000000e+00> : vector<8x256xf32>
    %46 = tpu.matmul %45, %40, %cst_21 {dimension_numbers = #tpu.dot_dimension_numbers<[1], [0], [0], [1], [0, 0, 1, 1], [], []>} : vector<8x8xf32>, vector<8x256xf32>, vector<8x256xf32> -> vector<8x256xf32>
    %c1_22 = arith.constant 1 : index
    %c0_23 = arith.constant 0 : index
    %c0_24 = arith.constant 0 : index
    %47 = vector.load %arg4[%c1_22, %c0_23, %c0_24] : memref<3x8x8xf32, #tpu.memory_space<vmem>>, vector<1x8x8xf32>
    %48 = vector.shape_cast %47 : vector<1x8x8xf32> to vector<8x8xf32>
    %cst_25 = arith.constant dense<0.000000e+00> : vector<8x256xf32>
    %49 = tpu.matmul %48, %35, %cst_25 {dimension_numbers = #tpu.dot_dimension_numbers<[1], [0], [0], [1], [0, 0, 1, 1], [], []>} : vector<8x8xf32>, vector<8x256xf32>, vector<8x256xf32> -> vector<8x256xf32>
    %50 = arith.addf %46, %49 : vector<8x256xf32>
    %c2_26 = arith.constant 2 : index
    %c0_27 = arith.constant 0 : index
    %c0_28 = arith.constant 0 : index
    %51 = vector.load %arg4[%c2_26, %c0_27, %c0_28] : memref<3x8x8xf32, #tpu.memory_space<vmem>>, vector<1x8x8xf32>
    %52 = vector.shape_cast %51 : vector<1x8x8xf32> to vector<8x8xf32>
    %cst_29 = arith.constant dense<0.000000e+00> : vector<8x256xf32>
    %53 = tpu.matmul %52, %43, %cst_29 {dimension_numbers = #tpu.dot_dimension_numbers<[1], [0], [0], [1], [0, 0, 1, 1], [], []>} : vector<8x8xf32>, vector<8x256xf32>, vector<8x256xf32> -> vector<8x256xf32>
    %54 = arith.addf %50, %53 : vector<8x256xf32>
    %c0_30 = arith.constant 0 : index
    %c0_31 = arith.constant 0 : index
    %55 = vector.load %arg5[%c0_30, %c0_31] : memref<8x4xf32, #tpu.memory_space<vmem>>, vector<8x4xf32>
    %cst_32 = arith.constant dense<0.000000e+00> : vector<8x256xf32>
    %56 = tpu.matmul %55, %8, %cst_32 {dimension_numbers = #tpu.dot_dimension_numbers<[1], [0], [0], [1], [0, 0, 1, 1], [], []>} : vector<8x4xf32>, vector<4x256xf32>, vector<8x256xf32> -> vector<8x256xf32>
    %57 = arith.addf %54, %56 : vector<8x256xf32>
    %58 = arith.index_cast %c0_i32_0 : i32 to index
    %c0_33 = arith.constant 0 : index
    %c0_34 = arith.constant 0 : index
    %59 = vector.load %arg6[%58, %c0_33, %c0_34] : memref<1x8x256xf32, #tpu.memory_space<vmem>>, vector<1x8x256xf32>
    %60 = vector.shape_cast %59 : vector<1x8x256xf32> to vector<8x256xf32>
    %61 = vector.shape_cast %57 : vector<8x256xf32> to vector<1x8x256xf32>
    tpu.vector_store %arg6[%58, %c0_33, %c0_34], %61 {strides = array<i32>} : memref<1x8x256xf32, #tpu.memory_space<vmem>>, vector<1x8x256xf32>,
    %c1_i32_35 = arith.constant 1 : i32
    return
  }
  func.func @transform_0(%arg0: i32) -> (i32, i32, i32) {
    %c0_i32 = arith.constant 0 : i32
    %c0_i32_0 = arith.constant 0 : i32
    %c0_i32_1 = arith.constant 0 : i32
    return %arg0, %c0_i32, %c0_i32_0 : i32, i32, i32
  }
  func.func @transform_1(%arg0: i32) -> (i32, i32, i32) {
    %c0_i32 = arith.constant 0 : i32
    %c0_i32_0 = arith.constant 0 : i32
    %c0_i32_1 = arith.constant 0 : i32
    %c0_i32_2 = arith.constant 0 : i32
    return %c0_i32, %c0_i32_0, %c0_i32_1 : i32, i32, i32
  }
  func.func @transform_2(%arg0: i32) -> (i32, i32) {
    %c0_i32 = arith.constant 0 : i32
    %c0_i32_0 = arith.constant 0 : i32
    %c0_i32_1 = arith.constant 0 : i32
    return %c0_i32, %c0_i32_0 : i32, i32
  }
  func.func @transform_3(%arg0: i32) -> (i32, i32, i32) {
    %c0_i32 = arith.constant 0 : i32
    %c0_i32_0 = arith.constant 0 : i32
    %c0_i32_1 = arith.constant 0 : i32
    %c0_i32_2 = arith.constant 0 : i32
    return %c0_i32, %c0_i32_0, %c0_i32_1 : i32, i32, i32
  }
  func.func @transform_4(%arg0: i32) -> (i32, i32) {
    %c0_i32 = arith.constant 0 : i32
    %c0_i32_0 = arith.constant 0 : i32
    %c0_i32_1 = arith.constant 0 : i32
    return %c0_i32, %c0_i32_0 : i32, i32
  }
  func.func @transform_5(%arg0: i32) -> (i32, i32, i32) {
    %c0_i32 = arith.constant 0 : i32
    %c0_i32_0 = arith.constant 0 : i32
    %c0_i32_1 = arith.constant 0 : i32
    return %arg0, %c0_i32, %c0_i32_0 : i32, i32, i32
  }
}

</mosaic_0001>

<bundles_post_ra>
// kernel: input_residual_conv.2
= control target key start
LH: loop header
LB: loop body
LE: loop exit
PB: predicated region body
PF: predicated region fallthrough
CT: control target
= control target key end

     0   :  { %s631_s12 = smov 0   ;;  %s674_s0 = inlined_call_operand.vmem [shape: f32[2,4,256], index: 0, kind: input, shape index: {}]   ;;  %s675_s1 = inlined_call_operand.vmem [shape: f32[3,8,4], index: 1, kind: input, shape index: {}]   ;;  %s676_s2 = inlined_call_operand.vmem [shape: f32[2,8,1], index: 2, kind: output, shape index: {0}]   ;;  %s677_s3 = inlined_call_operand.vmem [shape: f32[2,8,1], index: 3, kind: output, shape index: {1}]  }
   0x1 LB: > { %s561_s13 = sadd.s32 4294967295, %s606_s12   ;;  %p565_p0 = scmp.ge.s32.totalorder %s606_s12, 1  ;;  %s606_s12 = sphi %s631_s12, %s14_s12  }
   0x2   : > { %p140_p1 = scmp.lt.s32.totalorder %s606_s12, 3 }
   0x4   : > { %p141_p2 = pnand %p565_p0, %p140_p1 }
   0x5   : > { %p167_p3 = scmp.lt.s32.totalorder (!%p141_p2), %s561_s13, 1  ;;  %v608_v0 = vmov (!%p141_p2), 0.0   ;;  %s609_s18 = smov (!%p141_p2), 127   ;;  %vm224_vm0 = vcmask (!%p141_p2), 1043456   ;;  %v570_v3 = vld [vmem:[%s675_s1 + $0x8] sm:$0xff] (!%p141_p2)  ;;  %vm220_vm1 = vcmask (!%p141_p2), 31744   ;;  %v180_v4 = vlaneseq (!%p141_p2) }
   0x6   : > { %144 = sbr.rel (%p141_p2) target bundleno = 509 (0x1fd), region = 28  ;;  %373 = vmatprep.mubr.f32.mxu0 (!%p141_p2), %v608_v0  ;;  %293 = vmatprep.mubr.f32.mxu1 (!%p141_p2), %v608_v0  ;;  %s610_s19 = smov (!%p141_p2), 1   ;;  %v217_v15 = vld [vmem:[%s675_s1] sm:$0xff] (!%p141_p2)  ;;  %v577_v18 = vld [vmem:[%s675_s1 + $0x10] sm:$0xff] (!%p141_p2)  ;;  %vm474_vm6 = vcmask (!%p141_p2), 7168  }
   0x7   : > { %v181_v5 = vand.u32 (!%p141_p2), 127, %v180_v4 }
   0x9   : > { %v182_v6 = vadd.s32 (!%p141_p2), 128, %v181_v5  ;;  %vm202_vm2 = vcmp.lt.s32.totalorder (!%p141_p2), %v181_v5, 127  ;;  %vm195_vm3 = vcmp.lt.s32.totalorder (!%p141_p2), %v181_v5, 1  ;;  %vm183_vm5 = vcmp.eq.s32.totalorder (!%p141_p2), %v181_v5, 0 }
   0xb   : > { %vm186_vm4 = vcmp.eq.s32.totalorder (!%p141_p2), %v182_v6, 255 }
   0xd   : > { %s679_s13 = smov (!%p167_p3, %s561_s13), 1 }
   0xe   : > { %s639_s14 = sshll.u32 %s679_s13, 3 }
   0xf   : > { %s171_s17 = scalar_lea.vmem %s674_s0, %s639_s14  ;;  %s175_s28 = scalar_lea.vmem %s676_s2, %s639_s14 }
  0x10   : > { %v187_v1 = vld [vmem:[%s171_s17] sm:$0xff]  ;;  %s179_s4 = scalar_lea.vmem %s677_s3, %s639_s14 }
  0x11   : > { %198 = vrot.lane.b32.xlu1 %v187_v1, %s609_s18  ;;  %191 = vrot.lane.b32.xlu0 %v187_v1, %s610_s19  ;;  %v189_v2 = vcombine.high %v187_v1, %v187_v1 }
  0x13   : > { %571 = vmatprep.subr.msk.mxu1 %vm224_vm0, %v189_v2 }
  0x14   : > { %572 = vmatpush1.msk.msra.mxu1 %vm224_vm0, %v187_v1 }
  0x15   : > { %200 = vrot.lane.b32.xlu1 %v189_v2, %s609_s18  ;;  %193 = vrot.lane.b32.xlu0 %v189_v2, %s610_s19 }
  0x16   : > { %573 = vmatmul.mubr.msk.f32.vlgmr.msra.gmra.mrb[0].mxu1 %vm220_vm1, %v570_v3 }
  0x83   : > { %v199_v7 = vpop.permute.xlu1 %198  ;;  %v192_v8 = vpop.permute.xlu0 %191 }
  0x87   : > { %v201_v9 = vpop.permute.xlu1 %200  ;;  %v194_v10 = vpop.permute.xlu0 %193 }
  0x88   : > { %v203_v11 = vsel %vm202_vm2, %v199_v7, %v201_v9  ;;  %v204_v12 = vsel %vm202_vm2, %v201_v9, %v199_v7  ;;  %v197_v13 = vsel %vm195_vm3, %v194_v10, %v192_v8  ;;  %v196_v14 = vsel %vm195_vm3, %v192_v8, %v194_v10 }
  0x89   : > { %v216_v16 = vsel %vm186_vm4, %v196_v14, %v204_v12  ;;  %574 = vmatprep.subr.msk.mxu0 %vm224_vm0, %v196_v14  ;;  %v209_v17 = vsel %vm183_vm5, %v203_v11, %v197_v13 }
  0x8a   : > { %575 = vmatpush1.msk.msra.mxu0 %vm224_vm0, %v209_v17 }
  0x8b   : > { %576 = vmatmul.mubr.msk.f32.vlgmr.msra.gmra.mrb[0].mxu0 %vm220_vm1, %v217_v15  ;;  %578 = vmatprep.subr.msk.mxu0 %vm224_vm0, %v216_v16 }
  0x8c   : > { %579 = vmatpush1.msk.msra.mxu0 %vm224_vm0, %v203_v11  ;;  %455 = vmatprep.mubr.f32.mxu0 %v608_v0 }
  0x93   : > { %580 = vmatmul.mubr.msk.f32.vlgmr.msra.gmra.mrb[0].mxu0 %vm220_vm1, %v577_v18 }
  0xe9   : > { %v295_v19 = vpop.f32.mrb[0].mxu1 }
  0xea   : > { %v297_v20 = vpop.f32.mrb[1].mxu1 }
 0x166   : > { %v457_v21 = vpop.f32.mrb[0].mxu0 }
 0x167   : > { %v584_v22 = vadd.f32 %v457_v21, %v295_v19  ;;  %v459_v23 = vpop.f32.mrb[1].mxu0 }
 0x168   : > { %v585_v24 = vadd.f32 %v459_v23, %v297_v20 }
 0x169   : > { %v468_v25 = vmul.f32 %v584_v22, %v584_v22 }
 0x16a   : > { %v469_v26 = vmul.f32 %v585_v24, %v585_v24  ;;  %v464_v27 = vadd.f32 %v585_v24, %v584_v22 }
 0x16c   : > { %465 = vadd.xlane.f32.xlu0 %v464_v27  ;;  %v470_v28 = vadd.f32 %v469_v26, %v468_v25 }
 0x16e   : > { %471 = vadd.xlane.f32.xlu1 %v470_v28 }
 0x1f9   : > { %v466_v29 = vpop.xlane.xlu0 %465 }
 0x1fa   : > { %475 = vst.msk [vmem:[%s175_s28] sm:$0xff] %vm474_vm6, %v466_v29 }
 0x1fb   : > { %v472_v30 = vpop.xlane.xlu1 %471 }
 0x1fc   : > { %476 = vst.msk [vmem:[%s179_s4] sm:$0xff] %vm474_vm6, %v472_v30 }
 0x1fd PF: > { %s14_s12 = sadd.s32 1, %s606_s12  }
 0x1fe   : > { %p11_p4 = scmp.ge.s32.totalorder %s14_s12, 4  }
 0x200   :  { %13 = sbr.rel (!%p11_p4) target bundleno = 1 (0x1), region = 72 }

// kernel: input_residual_conv.3
= control target key start
LH: loop header
LB: loop body
LE: loop exit
PB: predicated region body
PF: predicated region fallthrough
CT: control target
= control target key end

     0   :  { %10 = vsyncpa [#allocation3], 0  ;;  %s1287_s0 = inlined_call_operand.vmem [shape: f32[2,4,256], index: 0, kind: input, shape index: {}]   ;;  %s1288_s1 = inlined_call_operand.vmem [shape: f32[3,8,4], index: 1, kind: input, shape index: {}]   ;;  %s1289_s2 = inlined_call_operand.vmem [shape: f32[8,1], index: 2, kind: input, shape index: {}]   ;;  %s1290_s3 = inlined_call_operand.vmem [shape: f32[3,8,8], index: 3, kind: input, shape index: {}]   ;;  %s1291_s4 = inlined_call_operand.vmem [shape: f32[8,4], index: 4, kind: input, shape index: {}]   ;;  %s1292_s5 = inlined_call_operand.hbm [shape: f32[2,8,256], index: 5, kind: output, shape index: {}]  }
   0x1   :  { %12 = vsyncpa [#allocation3 + $0x1], 0  ;;  %s1107_s18 = smov 0   ;;  %s1109_s19 = smov 0  }
   0x2   :  { %s1111_s20 = smov 0   ;;  %s1113_s21 = smov 0  }
   0x3 LB: > { %s1128_s22 = sadd.s32 4294967295, %s1070_s21   ;;  %s920_s23 = sadd.s32 4294967294, %s1070_s21   ;;  %s1070_s21 = sphi %s1113_s21, %s1298_s21   ;;  %s1066_s20 = sphi %s1111_s20, %s1297_s20   ;;  %s1062_s19 = sphi %s1109_s19, %s1296_s19   ;;  %s1058_s18 = sphi %s1107_s18, %s1295_s18  }
   0x4   : > { %s1132_s24 = sadd.s32 1, %s1070_s21   ;;  %s135_s25 = sadd.s32 1, %s1066_s20 }
   0x5   : > { %s132_s26 = ssub.s32 %s1070_s21, %s1132_s24  ;;  %p145_p0 = scmp.ne.s32.totalorder %s1066_s20, %s1062_s19 }
   0x6   : > { %p133_p1 = scmp.eq.s32.totalorder %s132_s26, 0  ;;  %p146_p2 = scmp.eq.s32.totalorder %s1128_s22, 1 }
   0x7   : > { %p151_p3 = scmp.ne.s32.totalorder %s1062_s19, %s1058_s18  ;;  %p152_p4 = scmp.eq.s32.totalorder %s920_s23, 1 }
   0x8   : > { %s1143_s27 = scalar_select %p133_p1, %s1066_s20, %s135_s25  }
   0x9   : > { %p1145_p5 = por %p146_p2, %p145_p0  ;;  %p1149_p6 = por %p152_p4, %p151_p3 }
   0xa   : > { %p923_p7 = scmp.ge.s32.totalorder %s1070_s21, 1  ;;  %p190_p8 = scmp.lt.s32.totalorder %s1070_s21, 3 }
   0xc   : > { %p191_p9 = pnand %p923_p7, %p190_p8 }
   0xd   : > { %p218_p10 = scmp.lt.s32.totalorder (!%p191_p9), %s1128_s22, 1  ;;  %v1072_v0 = vmov (!%p191_p9), 0.0   ;;  %vm267_vm0 = vcmask (!%p191_p9), 1043456   ;;  %s1073_s10 = smov (!%p191_p9), 127   ;;  %v927_v3 = vld [vmem:[%s1288_s1 + $0x8] sm:$0xff] (!%p191_p9)  ;;  %vm263_vm1 = vcmask (!%p191_p9), 31744   ;;  %v223_v6 = vlaneseq (!%p191_p9) }
   0xe   : > { %194 = sbr.rel (%p191_p9) target bundleno = 742 (0x2e6), region = 40  ;;  %336 = vmatprep.mubr.f32.mxu0 (!%p191_p9), %v1072_v0  ;;  %608 = vmatprep.mubr.f32.mxu1 (!%p191_p9), %v1072_v0  ;;  %s1074_s11 = smov (!%p191_p9), 1   ;;  %v1075_v4 = vmov (!%p191_p9), 0   ;;  %v507_v5 = vld [vmem:[%s1289_s2] sm:$0xff] (!%p191_p9)  ;;  %v934_v20 = vld [vmem:[%s1288_s1 + $0x10] sm:$0xff] (!%p191_p9)  ;;  %v938_v30 = vld [vmem:[%s1290_s3 + $0x8] sm:$0xff] (!%p191_p9) }
   0xf   : > { %1006 = vset.pattern.permute.xlu0 (!%p191_p9), %v1075_v4  ;;  %v224_v7 = vand.u32 (!%p191_p9), 127, %v223_v6  ;;  %v260_v17 = vld [vmem:[%s1288_s1] sm:$0xff] (!%p191_p9)  ;;  %vm540_vm8 = vcmask (!%p191_p9), 64512   ;;  %v941_v42 = vld [vmem:[%s1290_s3 + $0x10] sm:$0xff] (!%p191_p9)  ;;  %s215_s12 = sand.u32 (!%p191_p9), 1, %s1062_s19   ;;  %s952_s16 = sshll.u32 (!%p191_p9), %s1128_s22, 8 }
  0x10   : > { %v537_v39 = vld [vmem:[%s1290_s3] sm:$0xff] (!%p191_p9)  ;;  %s924_s13 = sshll.u32 (!%p191_p9), %s215_s12, 4  ;;  %s1247_s25 = scalar_lea.hbm (!%p191_p9), %s1292_s5, %s952_s16 }
  0x11   : > { %v225_v8 = vadd.s32 (!%p191_p9), 128, %v224_v7  ;;  %vm245_vm2 = vcmp.lt.s32.totalorder (!%p191_p9), %v224_v7, 127  ;;  %vm238_vm3 = vcmp.lt.s32.totalorder (!%p191_p9), %v224_v7, 1  ;;  %vm226_vm4 = vcmp.eq.s32.totalorder (!%p191_p9), %v224_v7, 0  ;;  %v767_v43 = vld [vmem:[%s1291_s4] sm:$0xff] (!%p191_p9)  ;;  %s217_s14 = scalar_lea.vmem (!%p191_p9), [#allocation2], %s924_s13 }
  0x12   : > { %s861_s15 = sshll.u32 (!%p191_p9), %s217_s14, 4  ;;  %s847_s26 = scalar_lea.sflag (!%p191_p9), [#allocation3], %s215_s12  ;;  %s1242_s15 = int_to_ptr.vmem [resolvable:$true] %s861_s15 }
  0x13   : > { %vm229_vm5 = vcmp.eq.s32.totalorder (!%p191_p9), %v225_v8, 255 }
  0x15   : > { %s219_s30 = scalar_select %p218_p10, %s1128_s22, 1 }
  0x16   : > { %s1076_s22 = smov [#allocation2]  }
  0x17   : > { %s951_s6 = sshll.u32 %s219_s30, 3  ;;  %s1008_s30 = scalar_lea.vmem %s1242_s15, 256 }
  0x18   : > { %s222_s9 = scalar_lea.vmem %s1287_s0, %s951_s6  ;;  %p1009_p11 = scmp.ne.s32.totalorder %s1242_s15, %s1008_s30 }
  0x19   : > { %v1162_v1 = vld [vmem:[%s222_s9] sm:$0xff]  ;;  %s1012_s6 = sshll.u32 %s1076_s22, 4  ;;  %s1013_s6 = int_to_ptr.vmem [resolvable:$false] %s1012_s6 }
  0x1a   : > { %241 = vrot.lane.b32.xlu1 %v1162_v1, %s1073_s10  ;;  %234 = vrot.lane.b32.xlu0 %v1162_v1, %s1074_s11  ;;  %v1170_v2 = vcombine.high %v1162_v1, %v1162_v1  ;;  %p1010_p12 = pnand %p1009_p11, %p1145_p5  ;;  %s1014_s7 = scalar_lea.vmem %s1013_s6, 512 }
  0x1b   : > { %p1015_p0 = scmp.lt.s32.totalorder %s1242_s15, %s1013_s6  ;;  %p1016_p1 = scmp.lt.s32.totalorder %s1014_s7, %s1008_s30 }
  0x1c   : > { %928 = vmatprep.subr.msk.mxu0 %vm267_vm0, %v1170_v2  ;;  %p1011_p13 = pneg %p1010_p12 }
  0x1d   : > { %929 = vmatpush1.msk.msra.mxu0 %vm267_vm0, %v1162_v1  ;;  %p1017_p2 = por %p1016_p1, %p1015_p0 }
  0x1e   : > { %243 = vrot.lane.b32.xlu1 %v1170_v2, %s1073_s10  ;;  %236 = vrot.lane.b32.xlu0 %v1170_v2, %s1074_s11 }
  0x1f   : > { %930 = vmatmul.mubr.msk.f32.vlgmr.msra.gmra.mrb[0].mxu0 %vm263_vm1, %v927_v3  ;;  %p1018_p3 = pnand %p1017_p2, %p1011_p13 }
  0x20   : > { %416 = vmatprep.mubr.f32.mxu0 %v1072_v0 }
  0x22   : > { %510 = vperm.xlu0 %1006, %v507_v5  }
  0x8c   : > { %v242_v9 = vpop.permute.xlu1 %241  ;;  %v235_v10 = vpop.permute.xlu0 %234 }
  0x90   : > { %v244_v11 = vpop.permute.xlu1 %243  ;;  %v237_v12 = vpop.permute.xlu0 %236 }
  0x91   : > { %v246_v13 = vsel %vm245_vm2, %v242_v9, %v244_v11  ;;  %v247_v14 = vsel %vm245_vm2, %v244_v11, %v242_v9  ;;  %v239_v15 = vsel %vm238_vm3, %v235_v10, %v237_v12  ;;  %v240_v16 = vsel %vm238_vm3, %v237_v12, %v235_v10 }
  0x92   : > { %v252_v18 = vsel %vm226_vm4, %v246_v13, %v240_v16  ;;  %931 = vmatprep.subr.msk.mxu0 %vm267_vm0, %v239_v15  ;;  %v259_v19 = vsel %vm229_vm5, %v239_v15, %v247_v14 }
  0x93   : > { %932 = vmatpush1.msk.msra.mxu0 %vm267_vm0, %v252_v18 }
  0x94   : > { %933 = vmatmul.mubr.msk.f32.vlgmr.msra.gmra.mrb[0].mxu0 %vm263_vm1, %v260_v17  ;;  %935 = vmatprep.subr.msk.mxu0 %vm267_vm0, %v259_v19 }
  0x95   : > { %936 = vmatpush1.msk.msra.mxu0 %vm267_vm0, %v246_v13  ;;  %498 = vmatprep.mubr.f32.mxu0 %v1072_v0 }
  0x9c   : > { %937 = vmatmul.mubr.msk.f32.vlgmr.msra.gmra.mrb[0].mxu0 %vm263_vm1, %v934_v20 }
  0xa1   : > { %v511_v21 = vpop.permute.xlu0 %510 }
 0x16f   : > { %v500_v22 = vpop.f32.mrb[0].mxu0 }
 0x170   : > { %v513_v23 = vadd.f32 %v511_v21, %v500_v22  ;;  %v502_v24 = vpop.f32.mrb[1].mxu0 }
 0x171   : > { %v514_v25 = vadd.f32 %v511_v21, %v502_v24 }
 0x172   : > { %v517_v26 = vmul.f32 0.01, %v513_v23  ;;  %vm515_vm6 = vcmp.gt.f32.partialorder %v513_v23, 0.0 }
 0x173   : > { %v518_v27 = vmul.f32 0.01, %v514_v25  ;;  %vm516_vm7 = vcmp.gt.f32.partialorder %v514_v25, 0.0 }
 0x174   : > { %v519_v28 = vsel %vm515_vm6, %v513_v23, %v517_v26 }
 0x175   : > { %527 = vrot.lane.b32.xlu0 %v519_v28, %s1073_s10  ;;  %521 = vrot.lane.b32.xlu1 %v519_v28, %s1074_s11  ;;  %v520_v29 = vsel %vm516_vm7, %v514_v25, %v518_v27 }
 0x176   : > { %544 = vmatprep.subr.mxu1 %v520_v29 }
 0x177   : > { %545 = vmatpush1.msra.mxu1 %v519_v28 }
 0x178   : > { %939 = vmatmul.mubr.msk.f32.vlgmr.msra.gmra.mrb[0].mxu1 %vm540_vm8, %v938_v30 }
 0x179   : > { %523 = vrot.lane.b32.xlu1 %v520_v29, %s1074_s11  ;;  %682 = vmatprep.mubr.f32.mxu1 %v1072_v0 }
 0x17d   : > { %529 = vrot.lane.b32.xlu1 %v520_v29, %s1073_s10 }
 0x1e7   : > { %v522_v31 = vpop.permute.xlu1 %521  ;;  %v528_v34 = vpop.permute.xlu0 %527 }
 0x1eb   : > { %v524_v32 = vpop.permute.xlu1 %523 }
 0x1ec   : > { %v525_v33 = vsel %vm238_vm3, %v522_v31, %v524_v32  ;;  %v526_v36 = vsel %vm238_vm3, %v524_v32, %v522_v31 }
 0x1ed   : > { %618 = vmatprep.subr.mxu1 %v525_v33 }
 0x1ef   : > { %v530_v35 = vpop.permute.xlu1 %529 }
 0x1f0   : > { %v531_v37 = vsel %vm245_vm2, %v528_v34, %v530_v35  ;;  %v532_v38 = vsel %vm245_vm2, %v530_v35, %v528_v34 }
 0x1f1   : > { %v533_v40 = vsel %vm226_vm4, %v531_v37, %v526_v36  ;;  %v536_v41 = vsel %vm229_vm5, %v525_v33, %v532_v38 }
 0x1f2   : > { %619 = vmatpush1.msra.mxu1 %v533_v40 }
 0x1f3   : > { %940 = vmatmul.mubr.msk.f32.vlgmr.msra.gmra.mrb[0].mxu1 %vm540_vm8, %v537_v39  ;;  %694 = vmatprep.subr.mxu1 %v536_v41 }
 0x1f4   : > { %695 = vmatpush1.msra.mxu1 %v531_v37  ;;  %758 = vmatprep.mubr.f32.mxu1 %v1072_v0 }
 0x1f5   : > { %943 = vmatprep.subr.msk.mxu1 %vm267_vm0, %v1170_v2 }
 0x1fb   : > { %942 = vmatmul.mubr.msk.f32.vlgmr.msra.gmra.mrb[0].mxu1 %vm540_vm8, %v941_v42 }
 0x1fc   : > { %944 = vmatpush1.msk.msra.mxu1 %vm267_vm0, %v1162_v1  ;;  %835 = vmatprep.mubr.f32.mxu1 %v1072_v0 }
 0x203   : > { %945 = vmatmul.mubr.msk.f32.vlgmr.msra.gmra.mrb[0].mxu1 %vm263_vm1, %v767_v43 }
 0x2d6   : > { %v837_v44 = vpop.f32.mrb[0].mxu1 }
 0x2d7   : > { %844 = vst [vmem:[%s217_s14] sm:$0xff] %v837_v44  ;;  %v839_v45 = vpop.f32.mrb[1].mxu1 }
 0x2d8   : > { %845 = vst [vmem:[%s217_s14 + $0x8] sm:$0xff] %v839_v45 }
 0x2d9   : > { %1021 = shalt.err (!%p1018_p3)
}
 0x2da   : > { %s1022_s8 = scalar_lea.hbm %s1247_s25, 256  ;;  %s1026_s11 = scalar_lea.hbm %s1292_s5, 512 }
 0x2db   : > { %p1023_p4 = scmp.ne.s32.totalorder %s1247_s25, %s1022_s8  ;;  %p1027_p9 = scmp.lt.u32.totalorder %s1247_s25, %s1292_s5 }
 0x2dc   : > { %p1028_p10 = scmp.lt.u32.totalorder %s1026_s11, %s1022_s8  ;;  %p1030_p12 = scmp.lt.u32.totalorder %s1022_s8, %s1247_s25 }
 0x2dd   : > { %p1024_p7 = pnand %p1023_p4, %p1145_p5 }
 0x2de   : > { %p1029_p11 = por %p1028_p10, %p1027_p9 }
 0x2df   : > { %p1025_p8 = pneg %p1024_p7 }
 0x2e0   : > { %p1031_p13 = por %p1030_p12, %p1029_p11 }
 0x2e2   : > { %p1032_p0 = pnand %p1031_p13, %p1025_p8 }
 0x2e4   : > { %1035 = shalt.err (!%p1032_p0)
}
 0x2e5   : > { %963 = dma.vmem_to_hbm [thread:$0]  (%p1145_p5), %s1242_s15, 256, %s1247_s25, %s847_s26  }
 0x2e6 PF: > { %p969_p1 = scmp.ge.s32.totalorder %s1070_s21, 2  ;;  %s873_s14 = sand.u32 1, %s1058_s18  }
 0x2e7   : > { %s874_s16 = scalar_lea.sflag [#allocation3], %s873_s14 }
 0x2e8   : > { %p966_p2 = pnand %p969_p1, %p1149_p6 }
 0x2ea   : > { %1053 = dma.done.wait (!%p966_p2), %s874_s16, 256  }
 0x2eb   : > { %1055 = vsyncadd (!%p966_p2), %s874_s16, 4294967040  ;;  %p15_p3 = scmp.ge.s32.totalorder %s1132_s24, 4   ;;  %s1295_s18 = smov %s1062_s19 }
 0x2ec   : > { %s1296_s19 = smov %s1066_s20  ;;  %s1297_s20 = smov %s1143_s27 }
 0x2ed   : > { %s1298_s21 = smov %s1132_s24  ;;  %17 = sbr.rel (!%p15_p3) target bundleno = 3 (0x3), region = 79 }
 0x2f4   :  { %879 = vsyncpa [#allocation3], 1 }
 0x2f5   :  { %881 = vsyncpa [#allocation3 + $0x1], 1 }

</bundles_post_ra>
